<compile_context>
chip_gen: v7x
topology: tpu7x:2x2x1
jax: 0.10.0
libtpu: 0.0.40
codegen_flags: <defaults>
</compile_context>

<pallas_src>
import jax
import jax.numpy as jnp
from jax.experimental import pallas as pl
from jax.experimental.pallas import tpu as pltpu


def _pairwise_sub_kernel(x_ref, o_ref):
    # x_ref: (Bb, F, Tb) in the input dtype; o_ref: (Bb, P, Tb) float32.
    f = x_ref.shape[1]
    x = x_ref[...]                          # single tile load
    slabs = []
    # F is small and static -> fully unrolled at trace time.  Each outer
    # iteration emits one sublane-broadcast subtract covering all pairs
    # (i, j > i); all slabs are then written with ONE unmasked block store.
    for i in range(f - 1):
        xi = x[:, i:i + 1, :]               # (Bb, 1, Tb)
        xj = x[:, i + 1:, :]                # (Bb, F-1-i, Tb)
        slabs.append(xi - xj)               # subtract in input dtype (matches ref)
    out = slabs[0] if len(slabs) == 1 else jnp.concatenate(slabs, axis=1)
    o_ref[...] = out.astype(o_ref.dtype)    # one full-block store, cast here


def _choose_tiles(batch, f, p, out_t, in_itemsize, out_itemsize,
                  vmem_budget_bytes=20 << 20):
    """Pick (batch_tile, time_tile) so double-buffered in+out blocks fit VMEM.

    Padding-aware: F and P are padded to the 8-sublane tile when estimating
    the footprint.  Also guarantees >= 2 grid steps (megacore / v7x) whenever
    the problem can be split.
    """
    f_pad = -(-f // 8) * 8
    p_pad = -(-p // 8) * 8

    # Time tile: full axis if it fits a single lane-dense block, else a large
    # multiple of 128 (fewer grid steps -> closer to the HBM roofline; fixed
    # ~0.35 us per step).
    tb = out_t if out_t <= 4096 else 4096

    def step_bytes(bb_, tb_):
        # 2x for BlockSpec double buffering of the input and output blocks.
        return 2 * bb_ * tb_ * (f_pad * in_itemsize + p_pad * out_itemsize)

    bb = min(batch, 16)
    while bb > 1 and step_bytes(bb, tb) > vmem_budget_bytes:
        bb = max(1, bb // 2)
    while tb > 128 and step_bytes(bb, tb) > vmem_budget_bytes:
        tb = ((tb // 2) // 128) * 128 or 128   # shrink to a 128-multiple

    # Megacore: v7x has 2 TensorCores; a (1, 1) grid leaves one idle.
    if pl.cdiv(batch, bb) * pl.cdiv(out_t, tb) < 2:
        if batch >= 2:
            bb = -(-batch // 2)                     # split the batch axis
        elif out_t >= 256:
            half = -(-out_t // 2)
            tb = max(128, -(-half // 128) * 128)    # split the time axis
        # else: single tiny tile, nothing useful to split
    return bb, tb


def ts_sub(x, min_len, stride):
    """Pallas implementation of TsSub.forward (requires min_len == 1)."""
    assert min_len == 1, "TsSub reference semantics only well-defined for min == 1"
    b, f, s = x.shape
    out_t = (s - min_len) // stride + 1
    p = f * (f - 1) // 2
    out_dtype = jnp.float32  # PyTorch output buffer is torch.zeros -> float32

    if b == 0 or p == 0 or out_t <= 0:
        return jnp.zeros((b, p, max(out_t, 0)), out_dtype)

    # Strided time subsample.  stride == 1 is fully fused (no HBM copy);
    # stride > 1 gathers in the ORIGINAL dtype (no f32 upcast on the wire).
    if stride == 1:
        x_sub = x if out_t == s else jax.lax.slice(x, (0, 0, 0), (b, f, out_t))
    else:
        x_sub = jax.lax.slice(
            x, (0, 0, 0), (b, f, (out_t - 1) * stride + 1), (1, 1, stride))

    bb, tb = _choose_tiles(b, f, p, out_t,
                           jnp.dtype(x_sub.dtype).itemsize,
                           jnp.dtype(out_dtype).itemsize)
    grid = (pl.cdiv(b, bb), pl.cdiv(out_t, tb))

    return pl.pallas_call(
        _pairwise_sub_kernel,
        out_shape=jax.ShapeDtypeStruct((b, p, out_t), out_dtype),
        grid=grid,
        in_specs=[pl.BlockSpec((bb, f, tb), lambda bi, ti: (bi, 0, ti))],
        out_specs=pl.BlockSpec((bb, p, tb), lambda bi, ti: (bi, 0, ti)),
        compiler_params=pltpu.CompilerParams(
            dimension_semantics=("parallel", "parallel"),
            vmem_limit_bytes=32 * 1024 * 1024,
        ),
    )(x_sub)


def _ts_sub_ref(x, min_len, stride):
    """Pure-JAX reference mirroring the PyTorch loops (min == 1)."""
    b, f, s = x.shape
    out_t = (s - min_len) // stride + 1
    lim = (out_t - 1) * stride + 1
    cols = []
    for i in range(f):
        for j in range(i + 1, f):
            cols.append(x[:, i, :lim:stride] - x[:, j, :lim:stride])
    return jnp.stack(cols, axis=1).astype(jnp.float32)


if __name__ == "__main__":
    # Small shape matching the module's (batch, features, seq) input layout.
    B, F, S = 2, 4, 16
    MIN, STRIDE = 1, 2
    x = jax.random.normal(jax.random.PRNGKey(0), (B, F, S), dtype=jnp.float32)

    out = jax.block_until_ready(ts_sub(x, MIN, STRIDE))
    ref = _ts_sub_ref(x, MIN, STRIDE)
    assert out.shape == (B, F * (F - 1) // 2, (S - MIN) // STRIDE + 1)
    assert jnp.allclose(out, ref, atol=1e-6, rtol=1e-6)

    # Larger shape exercising the tiled (batch, time) grid + megacore split.
    B2, F2, S2 = 16, 5, 4096
    x2 = jax.random.normal(jax.random.PRNGKey(0), (B2, F2, S2), dtype=jnp.float32)
    out2 = jax.block_until_ready(ts_sub(x2, 1, 2))
    ref2 = _ts_sub_ref(x2, 1, 2)
    assert out2.shape == (B2, F2 * (F2 - 1) // 2, (S2 - 1) // 2 + 1)
    assert jnp.allclose(out2, ref2, atol=1e-6, rtol=1e-6)

    # stride == 1 path with a non-128-multiple time axis and a partial batch
    # block (exercises clipped edge blocks).
    B3, F3, S3 = 3, 3, 300
    x3 = jax.random.normal(jax.random.PRNGKey(0), (B3, F3, S3), dtype=jnp.float32)
    out3 = jax.block_until_ready(ts_sub(x3, 1, 1))
    ref3 = _ts_sub_ref(x3, 1, 1)
    assert out3.shape == (B3, F3 * (F3 - 1) // 2, S3)
    assert jnp.allclose(out3, ref3, atol=1e-6, rtol=1e-6)

    print("KERNEL_OK")
</pallas_src>

<mosaic_0001>
module attributes {stable_mosaic.version = 11 : i64} {
  func.func @_pairwise_sub_kernel(%arg0: i32, %arg1: i32, %arg2: memref<1x4x8xf32, #tpu.memory_space<vmem>>, %arg3: memref<1x6x8xf32, #tpu.memory_space<vmem>>) attributes {dimension_semantics = [#tpu.dimension_semantics<parallel>, #tpu.dimension_semantics<parallel>], iteration_bounds = array<i64: 2, 1>, scalar_prefetch = 0 : i64, scratch_operands = 0 : i64, tpu.core_type = #tpu.core_type<tc>, window_params = [{transform_indices = @transform_0, window_bounds = array<i64: 1, 4, 8>}, {transform_indices = @transform_1, window_bounds = array<i64: 1, 6, 8>}]} {
    %c0 = arith.constant 0 : index
    %c0_0 = arith.constant 0 : index
    %c0_1 = arith.constant 0 : index
    %0 = vector.load %arg2[%c0, %c0_0, %c0_1] : memref<1x4x8xf32, #tpu.memory_space<vmem>>, vector<1x4x8xf32>
    %1 = vector.extract_strided_slice %0 {offsets = [0, 0, 0], sizes = [1, 1, 8], strides = [1, 1, 1]} : vector<1x4x8xf32> to vector<1x1x8xf32>
    %2 = vector.extract_strided_slice %0 {offsets = [0, 1, 0], sizes = [1, 3, 8], strides = [1, 1, 1]} : vector<1x4x8xf32> to vector<1x3x8xf32>
    %3 = vector.broadcast %1 : vector<1x1x8xf32> to vector<1x3x8xf32>
    %4 = arith.subf %3, %2 : vector<1x3x8xf32>
    %5 = vector.extract_strided_slice %0 {offsets = [0, 1, 0], sizes = [1, 1, 8], strides = [1, 1, 1]} : vector<1x4x8xf32> to vector<1x1x8xf32>
    %6 = vector.extract_strided_slice %0 {offsets = [0, 2, 0], sizes = [1, 2, 8], strides = [1, 1, 1]} : vector<1x4x8xf32> to vector<1x2x8xf32>
    %7 = vector.broadcast %5 : vector<1x1x8xf32> to vector<1x2x8xf32>
    %8 = arith.subf %7, %6 : vector<1x2x8xf32>
    %9 = vector.extract_strided_slice %0 {offsets = [0, 2, 0], sizes = [1, 1, 8], strides = [1, 1, 1]} : vector<1x4x8xf32> to vector<1x1x8xf32>
    %10 = vector.extract_strided_slice %0 {offsets = [0, 3, 0], sizes = [1, 1, 8], strides = [1, 1, 1]} : vector<1x4x8xf32> to vector<1x1x8xf32>
    %11 = arith.subf %9, %10 : vector<1x1x8xf32>
    %12 = tpu.concatenate %4, %8, %11 in 1 : vector<1x3x8xf32>, vector<1x2x8xf32>, vector<1x1x8xf32> -> vector<1x6x8xf32>
    %c0_2 = arith.constant 0 : index
    %c0_3 = arith.constant 0 : index
    %c0_4 = arith.constant 0 : index
    %13 = vector.load %arg3[%c0_2, %c0_3, %c0_4] : memref<1x6x8xf32, #tpu.memory_space<vmem>>, vector<1x6x8xf32>
    tpu.vector_store %arg3[%c0_2, %c0_3, %c0_4], %12 {strides = array<i32>} : memref<1x6x8xf32, #tpu.memory_space<vmem>>, vector<1x6x8xf32>,
    return
  }
  func.func @transform_0(%arg0: i32, %arg1: i32) -> (i32, i32, i32) {
    %c0_i32 = arith.constant 0 : i32
    %c0_i32_0 = arith.constant 0 : i32
    return %arg0, %c0_i32, %arg1 : i32, i32, i32
  }
  func.func @transform_1(%arg0: i32, %arg1: i32) -> (i32, i32, i32) {
    %c0_i32 = arith.constant 0 : i32
    %c0_i32_0 = arith.constant 0 : i32
    return %arg0, %c0_i32, %arg1 : i32, i32, i32
  }
}

</mosaic_0001>

<bundles_post_ra>
// kernel: tpu_custom_call.1
= control target key start
LH: loop header
LB: loop body
LE: loop exit
PB: predicated region body
PF: predicated region fallthrough
CT: control target
= control target key end

     0   :  { %6 = vsyncpa [#allocation3], 0  ;;  %s553_s0 = inlined_call_operand.hbm [shape: f32[2,4,8], index: 0, kind: input, shape index: {}]   ;;  %s554_s1 = inlined_call_operand.vmem [shape: f32[2,6,8], index: 1, kind: output, shape index: {}]  }
   0x1   :  { %8 = vsyncpa [#allocation3 + $0x1], 0  ;;  %s428_s6 = smov 0   ;;  %s430_s7 = smov 0  }
   0x2   :  { %s432_s8 = smov 0   ;;  %s434_s9 = smov 0  }
   0x3   :  { %s436_s10 = smov 0   ;;  %s438_s11 = smov 0  }
   0x4 LB: > { %s269_s12 = sadd.s32 4294967295, %s415_s11   ;;  %s26_s13 = sadd.s32 1, %s411_s10  ;;  %s415_s11 = sphi %s438_s11, %s14_s11   ;;  %s411_s10 = sphi %s436_s10, %s564_s10   ;;  %s407_s9 = sphi %s434_s9, %s563_s9   ;;  %s403_s8 = sphi %s432_s8, %s562_s8   ;;  %s399_s7 = sphi %s430_s7, %s561_s7   ;;  %s395_s6 = sphi %s428_s6, %s560_s6  }
   0x5   : > { %p28_p0 = scmp.ge.s32.totalorder %s26_s13, 2  ;;  %s35_s14 = sadd.s32 1, %s403_s8 }
   0x6   : > { %p42_p1 = scmp.ne.s32.totalorder %s403_s8, %s399_s7  ;;  %p43_p2 = scmp.eq.s32.totalorder %s415_s11, 0 }
   0x7   : > { %s566_s13 = smov (%p28_p0, %s26_s13), 0  ;;  %p48_p4 = scmp.ne.s32.totalorder %s399_s7, %s395_s6 }
   0x8   : > { %p464_p3 = por %p43_p2, %p42_p1  ;;  %s30_s16 = ssub.s32 %s411_s10, %s566_s13 }
   0x9   : > { %p49_p5 = scmp.eq.s32.totalorder %s269_s12, 0  ;;  %p33_p6 = scmp.eq.s32.totalorder %s30_s16, 0 }
   0xa   : > { %p286_p8 = scmp.lt.s32.totalorder %s415_s11, 2  ;;  %s100_s19 = sand.u32 1, %s403_s8  }
   0xb   : > { %p471_p7 = por %p49_p5, %p48_p4  ;;  %s274_s20 = sshll.u32 %s411_s10, 6 }
   0xc   : > { %s477_s18 = scalar_select %p33_p6, %s403_s8, %s35_s14  }
   0xd   : > { %s273_s21 = sshll.u32 %s100_s19, 2  ;;  %s484_s24 = scalar_lea.hbm %s553_s0, %s274_s20 }
   0xe   : > { %s104_s25 = scalar_lea.vmem [#allocation2], %s273_s21  ;;  %p488_p9 = pnand %p286_p8, %p464_p3 }
   0xf   : > { %s112_s26 = sshll.u32 %s104_s25, 4  ;;  %s101_s28 = scalar_lea.sflag [#allocation3], %s100_s19  ;;  %s492_s26 = int_to_ptr.vmem [resolvable:$true] %s112_s26 }
  0x10   : > { %s335_s29 = scalar_lea.hbm %s484_s24, 64  ;;  %p337_p13 = pneg %p488_p9 }
  0x11   : > { %p336_p12 = scmp.ne.s32.totalorder %s484_s24, %s335_s29  ;;  %s340_s3 = scalar_lea.hbm %s553_s0, 128 }
  0x12   : > { %p341_p2 = scmp.lt.u32.totalorder %s484_s24, %s553_s0  ;;  %p342_p3 = scmp.lt.u32.totalorder %s340_s3, %s335_s29 }
  0x13   : > { %p338_p0 = pnand %p337_p13, %p336_p12  ;;  %p344_p5 = scmp.lt.u32.totalorder %s335_s29, %s484_s24 }
  0x14   : > { %p343_p4 = por %p342_p3, %p341_p2 }
  0x15   : > { %p339_p1 = pneg %p338_p0 }
  0x16   : > { %p345_p6 = por %p344_p5, %p343_p4 }
  0x18   : > { %p346_p8 = pnand %p345_p6, %p339_p1 }
  0x1a   : > { %349 = shalt.err (!%p346_p8)
}
  0x1b   : > { %s350_s6 = scalar_lea.vmem %s492_s26, 64  ;;  %s417_s12 = smov [#allocation2]  }
  0x1c   : > { %p351_p12 = scmp.ne.s32.totalorder %s492_s26, %s350_s6  ;;  %s355_s14 = sshll.u32 %s417_s12, 4  ;;  %s356_s14 = int_to_ptr.vmem [resolvable:$false] %s355_s14 }
  0x1d   : > { %s357_s15 = scalar_lea.vmem %s356_s14, 128  ;;  %p358_p11 = scmp.lt.s32.totalorder %s492_s26, %s356_s14 }
  0x1e   : > { %p353_p0 = pnand %p351_p12, %p337_p13  ;;  %p359_p2 = scmp.lt.s32.totalorder %s357_s15, %s350_s6 }
  0x20   : > { %p354_p10 = pneg %p353_p0  ;;  %p360_p3 = por %p359_p2, %p358_p11 }
  0x22   : > { %p361_p4 = pnand %p360_p3, %p354_p10 }
  0x24   : > { %364 = shalt.err (!%p361_p4)
}
  0x25   : > { %285 = dma.hbm_to_vmem [thread:$0]  (!%p488_p9), %s484_s24, 64, %s492_s26, %s101_s28  }
  0x26   : > { %p558_p1 = scmp.lt.s32.totalorder %s415_s11, 3  ;;  %p559_p5 = scmp.ge.s32.totalorder %s415_s11, 1 }
  0x28   : > { %p118_p13 = pnand %p559_p5, %p558_p1 }
  0x29   : > { %s123_s16 = sand.u32 (!%p118_p13), 1, %s399_s7  }
  0x2a   : > { %121 = sbr.rel (%p118_p13) target bundleno = 65 (0x41), region = 24  ;;  %s276_s19 = sshll.u32 (!%p118_p13), %s123_s16, 2 }
  0x2b   : > { %s124_s20 = scalar_lea.sflag (!%p118_p13), [#allocation3], %s123_s16  ;;  %s127_s21 = scalar_lea.vmem (!%p118_p13), [#allocation2], %s276_s19 }
  0x31   : > { %390 = dma.done.wait (%p471_p7), %s124_s20, 64  }
  0x32   : > { %392 = vsyncadd (%p471_p7), %s124_s20, 4294967232  ;;  %v156_v0 = vlaneseq  ;;  %p148_p10 = scmp.lt.s32.totalorder %s407_s9, 1  ;;  %v155_v4 = vld [vmem:[%s127_s21] sm:$0xf]  ;;  %vm179_vm0 = vcmask 1042432   ;;  %vm181_vm1 = vcmask 1044480  }
  0x33   : > { %v167_v7 = vrot.slane %v155_v4, 1  ;;  %vm183_vm2 = vcmask 62464  }
  0x34   : > { %v157_v1 = vshrl.u32 %v156_v0, 7  ;;  %s568_s9 = smov (!%p148_p10, %s407_s9), 1 }
  0x35   : > { %s277_s22 = sshll.u32 %s568_s9, 3  ;;  %v169_v10 = vsub.f32 %v155_v4, %v167_v7 }
  0x36   : > { %v158_v2 = vsub.s32 0, %v157_v1  ;;  %v163_v3 = vsub.s32 1, %v157_v1  ;;  %s154_s24 = scalar_lea.vmem %s554_s1, %s277_s22 }
  0x37   : > { %v177_v13 = vrot.slane %v169_v10, 5 }
  0x38   : > { %v159_v5 = vrot.slane %v155_v4, %v158_v2  ;;  %v164_v6 = vrot.slane %v155_v4, %v163_v3 }
  0x3a   : > { %v160_v8 = vsub.f32 %v159_v5, %v155_v4  ;;  %v165_v9 = vsub.f32 %v164_v6, %v155_v4 }
  0x3c   : > { %v171_v11 = vrot.slane %v160_v8, 1  ;;  %v174_v12 = vrot.slane %v165_v9, 7 }
  0x3e   : > { %v180_v14 = vsel %vm179_vm0, %v171_v11, %v174_v12 }
  0x3f   : > { %v182_v15 = vsel %vm181_vm1, %v180_v14, %v177_v13 }
  0x40   : > { %184 = vst.msk [vmem:[%s154_s24] sm:$0x3f] %vm183_vm2, %v182_v15 }
  0x41 PF: > { %s14_s11 = sadd.s32 1, %s415_s11   ;;  %s560_s6 = smov %s399_s7 }
  0x42   : > { %p11_p7 = scmp.ge.s32.totalorder %s14_s11, 4   ;;  %s561_s7 = smov %s403_s8 }
  0x43   : > { %s562_s8 = smov %s477_s18  ;;  %s563_s9 = smov %s411_s10 }
  0x44   : > { %s564_s10 = smov %s566_s13  ;;  %13 = sbr.rel (!%p11_p7) target bundleno = 4 (0x4), region = 64 }
  0x4b   :  { %210 = vsyncpa [#allocation3], 1 }
  0x4c   :  { %212 = vsyncpa [#allocation3 + $0x1], 1 }

</bundles_post_ra>
